<compile_context>
chip_gen: v5e
topology: v5e:2x2
jax: 0.10.0
libtpu: 0.0.40
codegen_flags: <defaults>
</compile_context>

<pallas_src>
import functools
import math

import jax
import jax.numpy as jnp
from jax.experimental import pallas as pl
from jax.experimental.pallas import tpu as pltpu


def make_pe_table(max_len, emb_size, dtype=jnp.float32):
    """Replicates the PyTorch __init__ buffer exactly: shape (max_len, 1, emb)."""
    position = jnp.arange(max_len, dtype=jnp.float32)[:, None]              # (L, 1)
    div_term = jnp.exp(
        jnp.arange(0, emb_size, 2, dtype=jnp.float32)
        * (-math.log(10000.0) / emb_size)
    )                                                                        # (E/2,)
    ang = position * div_term                                                # (L, E/2)
    pe = jnp.zeros((max_len, emb_size), jnp.float32)
    pe = pe.at[:, 0::2].set(jnp.sin(ang))
    pe = pe.at[:, 1::2].set(jnp.cos(ang))
    # pe.unsqueeze(0).transpose(0, 1)  ->  (max_len, 1, emb_size)
    return pe[:, None, :].astype(dtype)


def _pe_add_kernel(x_ref, pe_ref, o_ref, *, batch):
    # x_ref/o_ref: (tile_s, B*E)   pe_ref: (tile_s, E)
    pe = pe_ref[...]
    # Column b*E + e of the folded x view needs pe[:, e]: broadcast over the
    # batch axis (folded into lanes) = B lane-concatenated copies of the tile.
    pe_row = pe if batch == 1 else jnp.concatenate([pe] * batch, axis=-1)
    o_ref[...] = (x_ref[...] + pe_row).astype(o_ref.dtype)


def _choose_tile_s(S, B, E, itemsize):
    """Largest seq tile whose double-buffered working set fits ~16 MiB VMEM."""
    if S <= 16:
        return S                                   # single full block
    row_x = B * E * itemsize                       # one row of x / out
    row_pe = E * itemsize                          # one row of pe
    # double-buffered x-in, out, pe tiles + in-kernel broadcast temp
    per_row = 2 * (2 * row_x + row_pe) + row_x
    budget = 16 * 1024 * 1024
    t = budget // max(per_row, 1)
    # Cap at 512 rows: ~85% of HBM roofline, and keeps multi-step grids for
    # large S so v7x's two TensorCores both get work.
    t = int(max(16, min(t, 512, S)))
    return (t // 16) * 16                          # sublane-friendly (f32 & bf16)


def position_encoder_forward(x, pe):
    """x: (S, B, E); pe: (max_len, 1, E). Returns x + pe[:S] (eval dropout = identity)."""
    S, B, E = x.shape
    max_len = pe.shape[0]
    if S > max_len:
        raise ValueError(f"sequence length {S} exceeds positional table max_len {max_len}")

    x2 = x.reshape(S, B * E)                       # contiguous view: free reshape
    pe2 = pe[:S, 0, :].astype(x.dtype)             # (S, E), tiny vs. x

    itemsize = jnp.dtype(x.dtype).itemsize
    tile_s = _choose_tile_s(S, B, E, itemsize)
    grid = (pl.cdiv(S, tile_s),)

    bytes_accessed = (2 * S * B * E + S * E) * itemsize

    out2 = pl.pallas_call(
        functools.partial(_pe_add_kernel, batch=B),
        out_shape=jax.ShapeDtypeStruct((S, B * E), x.dtype),
        grid=grid,
        in_specs=[
            pl.BlockSpec((tile_s, B * E), lambda i: (i, 0)),   # x: seq in sublanes
            pl.BlockSpec((tile_s, E), lambda i: (i, 0)),       # pe: same seq rows
        ],
        out_specs=pl.BlockSpec((tile_s, B * E), lambda i: (i, 0)),
        compiler_params=pltpu.CompilerParams(
            dimension_semantics=("parallel",),                 # megacore-shardable
            vmem_limit_bytes=48 * 1024 * 1024,                 # safe on v5e/v6e/v7x
        ),
        cost_estimate=pl.CostEstimate(
            flops=S * B * E, transcendentals=0, bytes_accessed=bytes_accessed),
    )(x2, pe2)

    # nn.Dropout(p) in eval/inference mode is the identity, so nothing more to do.
    # TODO(synk): training-mode dropout (pltpu.prng_seed + stateful_bernoulli) omitted.
    return out2.reshape(S, B, E)


if __name__ == "__main__":
    # Small demo matching the module's intended shapes (seq-first transformer input).
    MAX_LEN, EMB = 64, 32
    SEQ, BATCH = 8, 2

    key = jax.random.PRNGKey(0)
    x = jax.random.normal(key, (SEQ, BATCH, EMB), dtype=jnp.float32)
    pe = make_pe_table(MAX_LEN, EMB)

    out = jax.block_until_ready(position_encoder_forward(x, pe))
    ref = x + pe[:SEQ]
    assert out.shape == (SEQ, BATCH, EMB)
    assert jnp.allclose(out, ref, atol=1e-6, rtol=1e-6)

    # Second check: exercises the multi-step tiled grid and boundary masking
    # (S=1000 -> two 512-row tiles, last partially masked), E multiple of 128.
    S2, B2, E2, MAX2 = 1000, 2, 128, 1024
    x2 = jax.random.normal(jax.random.PRNGKey(1), (S2, B2, E2), dtype=jnp.float32)
    pe_big = make_pe_table(MAX2, E2)
    out2 = jax.block_until_ready(position_encoder_forward(x2, pe_big))
    ref2 = x2 + pe_big[:S2]
    assert jnp.allclose(out2, ref2, atol=1e-6, rtol=1e-6)

    print("KERNEL_OK")
</pallas_src>

<mosaic_0001>
module attributes {stable_mosaic.version = 11 : i64} {
  func.func @_pe_add_kernel(%arg0: i32, %arg1: memref<8x64xf32, #tpu.memory_space<vmem>>, %arg2: memref<8x32xf32, #tpu.memory_space<vmem>>, %arg3: memref<8x64xf32, #tpu.memory_space<vmem>>) attributes {dimension_semantics = [#tpu.dimension_semantics<parallel>], iteration_bounds = array<i64: 1>, scalar_prefetch = 0 : i64, scratch_operands = 0 : i64, tpu.core_type = #tpu.core_type<tc>, window_params = [{transform_indices = @transform_0, window_bounds = array<i64: 8, 64>}, {transform_indices = @transform_1, window_bounds = array<i64: 8, 32>}, {transform_indices = @transform_2, window_bounds = array<i64: 8, 64>}]} {
    %c0 = arith.constant 0 : index
    %c0_0 = arith.constant 0 : index
    %0 = vector.load %arg2[%c0, %c0_0] : memref<8x32xf32, #tpu.memory_space<vmem>>, vector<8x32xf32>
    %1 = tpu.concatenate %0, %0 in 1 : vector<8x32xf32>, vector<8x32xf32> -> vector<8x64xf32>
    %c0_1 = arith.constant 0 : index
    %c0_2 = arith.constant 0 : index
    %2 = vector.load %arg1[%c0_1, %c0_2] : memref<8x64xf32, #tpu.memory_space<vmem>>, vector<8x64xf32>
    %3 = arith.addf %2, %1 : vector<8x64xf32>
    %c0_3 = arith.constant 0 : index
    %c0_4 = arith.constant 0 : index
    %4 = vector.load %arg3[%c0_3, %c0_4] : memref<8x64xf32, #tpu.memory_space<vmem>>, vector<8x64xf32>
    tpu.vector_store %arg3[%c0_3, %c0_4], %3 {strides = array<i32>} : memref<8x64xf32, #tpu.memory_space<vmem>>, vector<8x64xf32>,
    return
  }
  func.func @transform_0(%arg0: i32) -> (i32, i32) {
    %c0_i32 = arith.constant 0 : i32
    %c0_i32_0 = arith.constant 0 : i32
    return %arg0, %c0_i32 : i32, i32
  }
  func.func @transform_1(%arg0: i32) -> (i32, i32) {
    %c0_i32 = arith.constant 0 : i32
    %c0_i32_0 = arith.constant 0 : i32
    return %arg0, %c0_i32 : i32, i32
  }
  func.func @transform_2(%arg0: i32) -> (i32, i32) {
    %c0_i32 = arith.constant 0 : i32
    %c0_i32_0 = arith.constant 0 : i32
    return %arg0, %c0_i32 : i32, i32
  }
}

</mosaic_0001>

<bundles_post_ra>
// kernel: tpu_custom_call.1
= control target key start
LH: loop header
LB: loop body
LE: loop exit
PB: predicated region body
PF: predicated region fallthrough
CT: control target
= control target key end

     0   :  { %7 = vsyncpa [#allocation3], 0  ;;  %s179_s0 = inlined_call_operand.hbm [shape: f32[8,64], index: 0, kind: input, shape index: {}]   ;;  %s180_s1 = inlined_call_operand.hbm [shape: f32[8,32], index: 1, kind: input, shape index: {}]   ;;  %s181_s2 = inlined_call_operand.hbm [shape: f32[8,64], index: 2, kind: output, shape index: {}]  }
   0x1   :  { %8 = vsyncpa [#allocation6], 0 }
   0x2   :  { %9 = vsyncpa [#allocation4], 0  ;;  %s15_s11 = sshll.u32 %s179_s0, 4  ;;  %s151_s12 = smov [#allocation2]   ;;  %s16_s11 = int_to_ptr.hbm [resolvable:$true] %s15_s11 }
   0x3   :  { %s17_s13 = sshll.u32 %s151_s12, 4  ;;  %s26_s16 = sshll.u32 %s180_s1, 4  ;;  %s18_s13 = int_to_ptr.vmem [resolvable:$true] %s17_s13  ;;  %s27_s16 = int_to_ptr.hbm [resolvable:$true] %s26_s16 }
   0x4   :  { %20 = dma.hbm_to_vmem [thread:$0]  %s16_s11, 128, %s18_s13, [#allocation3]  }
   0x5   :  { %s152_s17 = smov [#allocation5]  }
   0x6   :  { %s28_s18 = sshll.u32 %s152_s17, 4  ;;  %s29_s18 = int_to_ptr.vmem [resolvable:$true] %s28_s18 }
   0x7   :  { %31 = dma.hbm_to_vmem [thread:$0]  %s27_s16, 128, %s29_s18, [#allocation6]  }
   0x8   :  { %145 = dma.done.wait [#allocation3], 128  }
   0x9   :  { %146 = vsyncadd [#allocation3], 4294967168 }
   0xa   :  { %147 = dma.done.wait [#allocation6], 128  }
   0xb   :  { %148 = vsyncadd [#allocation6], 4294967168  ;;  %v40_v0 = vld [vmem:[#allocation5] sm:$0xff]  ;;  %s153_s0 = smov 32   ;;  %vm45_vm0 = vcmask 261120   ;;  %v47_v1 = vld [vmem:[#allocation2] sm:$0xff] }
   0xc   :  { %42 = vrot.lane.b32.xlu0 %v40_v0, %s153_s0  ;;  %s154_s19 = smov [#allocation7]   ;;  %s58_s1 = sshll.u32 %s181_s2, 4  ;;  %vm49_vm1 = vcmask 523264   ;;  %s59_s1 = int_to_ptr.hbm [resolvable:$true] %s58_s1 }
   0xd   :  { %s56_s20 = sshll.u32 %s154_s19, 4  ;;  %s57_s20 = int_to_ptr.vmem [resolvable:$true] %s56_s20 }
  0x7e   :  { %v43_v2 = vpop.permute.xlu0 %42 }
  0x7f   :  { %v46_v3 = vsel %vm45_vm0, %v40_v0, %v43_v2 }
  0x80   :  { %v48_v4 = vadd.f32 %v47_v1, %v46_v3 }
  0x82   :  { %50 = vst.msk [vmem:[#allocation7] sm:$0xff] %vm49_vm1, %v48_v4 }
  0x83   :  { %61 = dma.vmem_to_hbm [thread:$0]  %s57_s20, 128, %s59_s1, [#allocation4]  }
  0x84   :  { %149 = dma.done.wait [#allocation4], 128  }
  0x85   :  { %150 = vsyncadd [#allocation4], 4294967168 }
  0x86   :  { %66 = vsyncpa [#allocation3], 1 }
  0x87   :  { %67 = vsyncpa [#allocation6], 1 }
  0x88   :  { %68 = vsyncpa [#allocation4], 1 }

</bundles_post_ra>
